<compile_context>
chip_gen: v7x
topology: tpu7x:2x2x1
jax: 0.10.0
libtpu: 0.0.40
codegen_flags: <defaults>
</compile_context>

<pallas_src>
import functools
import math

import jax
import jax.numpy as jnp
from jax.experimental import pallas as pl
from jax.experimental.pallas import tpu as pltpu

_BIG = 1e9


def _round_up(x, m):
    return (x + m - 1) // m * m


def _tile_costs(im_ref, s_ref, dcol_ref, drow_ref, *, margin, mask_diag):
    """Compute the (tm, tn) hinge-cost tiles for the current grid step."""
    scores = jax.lax.dot_general(
        im_ref[...], s_ref[...],
        dimension_numbers=(((1,), (1,)), ((), ())),      # 'md,nd->mn'
        preferred_element_type=jnp.float32)
    tm, tn = scores.shape
    t = scores + margin                                  # hoisted common term
    if mask_diag:
        # Skinny iotas: (tm,1) vs (1,tn) global indices.  One compare + one
        # select removes the diagonal from BOTH costs (relu(-BIG - d) == 0).
        row_g = pl.program_id(0) * tm + jax.lax.broadcasted_iota(
            jnp.int32, (tm, 1), 0)
        col_g = pl.program_id(1) * tn + jax.lax.broadcasted_iota(
            jnp.int32, (1, tn), 1)
        t = jnp.where(row_g == col_g, -_BIG, t)
    cost_s = jnp.maximum(t - dcol_ref[...], 0.0)         # vs diag of the row
    cost_im = jnp.maximum(t - drow_ref[...], 0.0)        # vs diag of the col
    return cost_s, cost_im


def _vsepp_sum_kernel(im_ref, s_ref, dcol_ref, drow_ref, out_ref, acc_ref, *,
                      margin):
    j = pl.program_id(1)
    nj = pl.num_programs(1)

    @pl.when(j == 0)
    def _init():
        acc_ref[...] = jnp.zeros_like(acc_ref)

    cost_s, cost_im = _tile_costs(im_ref, s_ref, dcol_ref, drow_ref,
                                  margin=margin, mask_diag=False)
    # Row-wise partial sums into a (tm, 1) accumulator; the scalar reduce and
    # the output store happen only once per row block.
    acc_ref[...] += jnp.sum(cost_s + cost_im, axis=1, keepdims=True)

    @pl.when(j == nj - 1)
    def _flush():
        out_ref[...] = jnp.full(out_ref.shape, jnp.sum(acc_ref[...]),
                                out_ref.dtype)


def _vsepp_max_kernel(im_ref, s_ref, dcol_ref, drow_ref, out_ref, colmax_ref,
                      acc_ref, *, margin):
    j = pl.program_id(1)
    nj = pl.num_programs(1)

    @pl.when(j == 0)
    def _init():
        acc_ref[...] = jnp.zeros_like(acc_ref)           # costs are >= 0

    cost_s, cost_im = _tile_costs(im_ref, s_ref, dcol_ref, drow_ref,
                                  margin=margin, mask_diag=True)

    # Running row max (cost_s direction), flushed once per row block.
    acc_ref[...] = jnp.maximum(acc_ref[...],
                               jnp.max(cost_s, axis=1, keepdims=True))

    # Per-(row block, column block) column-max partial of cost_im; the
    # cross-row-block max happens in the wrapper so the i axis can stay
    # megacore-parallel.
    cm = jnp.max(cost_im, axis=0, keepdims=True)         # (1, tn)
    colmax_ref[...] = jnp.broadcast_to(cm, colmax_ref.shape)

    @pl.when(j == nj - 1)
    def _flush():
        out_ref[...] = jnp.full(out_ref.shape, jnp.sum(acc_ref[...]),
                                out_ref.dtype)


def contrastive_loss(im, s, *, margin=0.0, max_violation=False,
                     block_m=None, block_n=None):
    """VSE++ ContrastiveLoss.forward (cosine_sim, loss_fn='vsepp')."""
    B, D = im.shape
    assert s.shape == (B, D)
    margin = float(margin)

    D_pad = max(_round_up(D, 128), 128)

    if block_n is None:
        block_n = 256 if B >= 256 else 128
    if block_m is None:
        block_m = 512
        # Cap tm so double-buffered bf16 im/s tiles plus f32 tile temporaries
        # stay well inside v7x's 32 MiB default scoped VMEM.
        while block_m > 128 and (2 * block_m * D_pad * 2
                                 + 2 * block_n * D_pad * 2
                                 + 4 * block_m * block_n * 4) > (12 << 20):
            block_m //= 2
    block_m = max(128, min(block_m, _round_up(B, 128)))
    block_n = max(128, min(block_n, _round_up(B, 128)))

    lcm_b = block_m * block_n // math.gcd(block_m, block_n)
    B_pad = _round_up(B, lcm_b)
    pad_b = B_pad - B
    if pad_b > 0 and D_pad - D < 2:
        D_pad += 128          # room for the two sentinel feature columns

    im_p = jnp.zeros((B_pad, D_pad), jnp.float32).at[:B, :D].set(
        im.astype(jnp.float32))
    s_p = jnp.zeros((B_pad, D_pad), jnp.float32).at[:B, :D].set(
        s.astype(jnp.float32))
    if pad_b > 0:
        # Sentinel features: score(x, padded item) ~= -1e9 in both directions,
        # so every padded cost entry clamps to zero inside the kernel (no
        # padding masks on the hot path).  Valid-vs-valid scores unchanged.
        im_p = im_p.at[:, D].set(1.0)
        s_p = s_p.at[B:, D].set(-_BIG)
        s_p = s_p.at[:, D + 1].set(1.0)
        im_p = im_p.at[B:, D + 1].set(-_BIG)

    # bf16 MXU feeds; accumulation stays f32 inside the kernel.
    im_bf = im_p.astype(jnp.bfloat16)
    s_bf = s_p.astype(jnp.bfloat16)

    # diag(im @ s.T) as a cheap O(B*D) row-wise dot over the SAME bf16
    # operands the MXU sees (keeps the analytic diagonal correction
    # consistent).  Padded rows get +BIG so their cost rows/cols clamp to 0.
    d = jnp.sum(im_bf.astype(jnp.float32) * s_bf.astype(jnp.float32),
                axis=1, keepdims=True)                    # (B_pad, 1)
    if pad_b > 0:
        d = jnp.where(jnp.arange(B_pad)[:, None] < B, d, _BIG)
    d_col = d
    d_row = d.reshape(1, B_pad)

    nbm = B_pad // block_m
    nbn = B_pad // block_n

    in_specs = [
        pl.BlockSpec((block_m, D_pad), lambda i, j: (i, 0)),   # im rows
        pl.BlockSpec((block_n, D_pad), lambda i, j: (j, 0)),   # s rows (stream)
        pl.BlockSpec((block_m, 1), lambda i, j: (i, 0)),       # diag (col form)
        pl.BlockSpec((1, block_n), lambda i, j: (0, j)),       # diag (row form)
    ]
    # Per-row-block scalar partials, stored as lane-dense (1, 8, 128) slabs so
    # the i axis can be "parallel" (split across v7x's two TensorCores).
    partial_spec = pl.BlockSpec((1, 8, 128), lambda i, j: (i, 0, 0))
    partial_shape = jax.ShapeDtypeStruct((nbm, 8, 128), jnp.float32)

    cost_est = pl.CostEstimate(
        flops=2 * B_pad * B_pad * D_pad,
        transcendentals=0,
        bytes_accessed=(nbm + 1) * B_pad * D_pad * 2      # im once, s re-streamed
        + (nbn + 1) * B_pad * 4 + nbm * 8 * 128 * 4)

    compiler_params = pltpu.CompilerParams(
        dimension_semantics=("parallel", "arbitrary"))

    if not max_violation:
        out = pl.pallas_call(
            functools.partial(_vsepp_sum_kernel, margin=margin),
            out_shape=partial_shape,
            grid_spec=pltpu.PrefetchScalarGridSpec(
                num_scalar_prefetch=0,
                grid=(nbm, nbn),
                in_specs=in_specs,
                out_specs=partial_spec,
                scratch_shapes=[pltpu.VMEM((block_m, 1), jnp.float32)],
            ),
            compiler_params=compiler_params,
            cost_estimate=cost_est,
        )(im_bf, s_bf, d_col, d_row)
        # Valid diagonal entries contribute exactly relu(margin) to each of
        # cost_s and cost_im; remove them analytically instead of masking.
        return jnp.sum(out[:, 0, 0]) - 2.0 * B * max(margin, 0.0)

    out, colmax = pl.pallas_call(
        functools.partial(_vsepp_max_kernel, margin=margin),
        out_shape=(partial_shape,
                   jax.ShapeDtypeStruct((nbm, 8, B_pad), jnp.float32)),
        grid_spec=pltpu.PrefetchScalarGridSpec(
            num_scalar_prefetch=0,
            grid=(nbm, nbn),
            in_specs=in_specs,
            out_specs=(partial_spec,
                       pl.BlockSpec((1, 8, block_n), lambda i, j: (i, 0, j))),
            scratch_shapes=[pltpu.VMEM((block_m, 1), jnp.float32)],
        ),
        compiler_params=compiler_params,
        cost_estimate=cost_est,
    )(im_bf, s_bf, d_col, d_row)
    row_term = jnp.sum(out[:, 0, 0])                     # sum of row maxes
    col_term = jnp.sum(jnp.max(colmax[:, 0, :], axis=0))  # sum of col maxes
    return row_term + col_term


def _reference_loss(im, s, margin=0.0, max_violation=False):
    scores = jnp.dot(im, s.T, precision=jax.lax.Precision.HIGHEST)
    diag = jnp.diag(scores)[:, None]
    cost_s = jnp.maximum(margin + scores - diag, 0.0)
    cost_im = jnp.maximum(margin + scores - diag.T, 0.0)
    eye = jnp.eye(scores.shape[0], dtype=bool)
    cost_s = jnp.where(eye, 0.0, cost_s)
    cost_im = jnp.where(eye, 0.0, cost_im)
    if max_violation:
        cost_s = cost_s.max(axis=1)
        cost_im = cost_im.max(axis=0)
    return cost_s.sum() + cost_im.sum()


if __name__ == "__main__":
    root = jax.random.PRNGKey(0)

    cases = [
        # (B, D, margin, max_violation, block_m, block_n)
        (256, 128, 0.0, False, 128, 128),   # aligned, 2x2 tile grid, sum path
        (256, 128, 0.2, True, 128, 128),    # aligned, max-violation path
        (100, 48, 0.1, False, None, None),  # unaligned -> sentinel padding
        (100, 48, 0.1, True, None, None),
        (384, 200, 0.15, False, 256, 128),  # tm != tn, diag straddles tiles
        (384, 200, 0.15, True, 256, 128),
    ]
    for idx, (B, D, margin, mv, bm, bn) in enumerate(cases):
        k_im, k_s = jax.random.split(jax.random.fold_in(root, idx))
        im = jax.random.normal(k_im, (B, D), dtype=jnp.float32)
        s = jax.random.normal(k_s, (B, D), dtype=jnp.float32)
        # embeddings are L2-normalized upstream in VSE++
        im = im / jnp.linalg.norm(im, axis=-1, keepdims=True)
        s = s / jnp.linalg.norm(s, axis=-1, keepdims=True)

        loss = contrastive_loss(im, s, margin=margin, max_violation=mv,
                                block_m=bm, block_n=bn)
        loss = jax.block_until_ready(loss)
        ref = _reference_loss(im, s, margin=margin, max_violation=mv)
        # bf16 MXU feeds -> slightly looser tolerance vs. the f32 reference.
        assert jnp.allclose(loss, ref, rtol=2e-2, atol=2e-2), (
            idx, float(loss), float(ref))

    print("KERNEL_OK")
</pallas_src>

<mosaic_0001>
module attributes {stable_mosaic.version = 11 : i64} {
  func.func @_vsepp_sum_kernel(%arg0: i32, %arg1: i32, %arg2: memref<128x128xbf16, #tpu.memory_space<vmem>>, %arg3: memref<128x128xbf16, #tpu.memory_space<vmem>>, %arg4: memref<128x1xf32, #tpu.memory_space<vmem>>, %arg5: memref<1x128xf32, #tpu.memory_space<vmem>>, %arg6: memref<1x8x128xf32, #tpu.memory_space<vmem>>, %arg7: memref<128x1xf32, #tpu.memory_space<vmem>>) attributes {dimension_semantics = [#tpu.dimension_semantics<parallel>, #tpu.dimension_semantics<arbitrary>], iteration_bounds = array<i64: 2, 2>, scalar_prefetch = 0 : i64, scratch_operands = 1 : i64, tpu.core_type = #tpu.core_type<tc>, window_params = [{transform_indices = @transform_0, window_bounds = array<i64: 128, 128>}, {transform_indices = @transform_1, window_bounds = array<i64: 128, 128>}, {transform_indices = @transform_2, window_bounds = array<i64: 128, 1>}, {transform_indices = @transform_3, window_bounds = array<i64: 1, 128>}, {transform_indices = @transform_4, window_bounds = array<i64: 1, 8, 128>}]} {
    %c0_i32 = arith.constant 0 : i32
    %0 = arith.cmpi eq, %arg1, %c0_i32 : i32
    %1 = arith.extui %0 : i1 to i32
    %c0_i32_0 = arith.constant 0 : i32
    %2 = arith.cmpi ne, %1, %c0_i32_0 : i32
    scf.if %2 {
      %cst_17 = arith.constant 0.000000e+00 : f32
      %27 = vector.broadcast %cst_17 : f32 to vector<128x1xf32>
      %c0_18 = arith.constant 0 : index
      %c0_19 = arith.constant 0 : index
      %28 = vector.load %arg7[%c0_18, %c0_19] : memref<128x1xf32, #tpu.memory_space<vmem>>, vector<128x1xf32>
      tpu.vector_store %arg7[%c0_18, %c0_19], %27 {strides = array<i32>} : memref<128x1xf32, #tpu.memory_space<vmem>>, vector<128x1xf32>,
    } else {
    }
    %c0 = arith.constant 0 : index
    %c0_1 = arith.constant 0 : index
    %3 = vector.load %arg2[%c0, %c0_1] : memref<128x128xbf16, #tpu.memory_space<vmem>>, vector<128x128xbf16>
    %c0_2 = arith.constant 0 : index
    %c0_3 = arith.constant 0 : index
    %4 = vector.load %arg3[%c0_2, %c0_3] : memref<128x128xbf16, #tpu.memory_space<vmem>>, vector<128x128xbf16>
    %cst = arith.constant dense<0.000000e+00> : vector<128x128xf32>
    %5 = tpu.matmul %3, %4, %cst {dimension_numbers = #tpu.dot_dimension_numbers<[1], [1], [0], [0], [0, 0, 1, 0], [], []>} : vector<128x128xbf16>, vector<128x128xbf16>, vector<128x128xf32> -> vector<128x128xf32>
    %cst_4 = arith.constant 0.000000e+00 : f32
    %6 = vector.broadcast %cst_4 : f32 to vector<128x128xf32>
    %7 = arith.addf %5, %6 : vector<128x128xf32>
    %c0_5 = arith.constant 0 : index
    %c0_6 = arith.constant 0 : index
    %8 = vector.load %arg4[%c0_5, %c0_6] : memref<128x1xf32, #tpu.memory_space<vmem>>, vector<128x1xf32>
    %9 = vector.broadcast %8 : vector<128x1xf32> to vector<128x128xf32>
    %10 = arith.subf %7, %9 : vector<128x128xf32>
    %cst_7 = arith.constant 0.000000e+00 : f32
    %11 = vector.broadcast %cst_7 : f32 to vector<128x128xf32>
    %12 = arith.maximumf %10, %11 : vector<128x128xf32>
    %c0_8 = arith.constant 0 : index
    %c0_9 = arith.constant 0 : index
    %13 = vector.load %arg5[%c0_8, %c0_9] : memref<1x128xf32, #tpu.memory_space<vmem>>, vector<1x128xf32>
    %14 = vector.broadcast %13 : vector<1x128xf32> to vector<128x128xf32>
    %15 = arith.subf %7, %14 : vector<128x128xf32>
    %cst_10 = arith.constant 0.000000e+00 : f32
    %16 = vector.broadcast %cst_10 : f32 to vector<128x128xf32>
    %17 = arith.maximumf %15, %16 : vector<128x128xf32>
    %c0_11 = arith.constant 0 : index
    %c0_12 = arith.constant 0 : index
    %18 = vector.load %arg7[%c0_11, %c0_12] : memref<128x1xf32, #tpu.memory_space<vmem>>, vector<128x1xf32>
    %19 = arith.addf %12, %17 : vector<128x128xf32>
    %cst_13 = arith.constant dense<0.000000e+00> : vector<128xf32>
    %20 = vector.multi_reduction <add>, %19, %cst_13 [1] : vector<128x128xf32> to vector<128xf32>
    %21 = vector.shape_cast %20 : vector<128xf32> to vector<128x1xf32>
    %22 = arith.addf %18, %21 : vector<128x1xf32>
    %c0_14 = arith.constant 0 : index
    %c0_15 = arith.constant 0 : index
    %23 = vector.load %arg7[%c0_14, %c0_15] : memref<128x1xf32, #tpu.memory_space<vmem>>, vector<128x1xf32>
    tpu.vector_store %arg7[%c0_14, %c0_15], %22 {strides = array<i32>} : memref<128x1xf32, #tpu.memory_space<vmem>>, vector<128x1xf32>,
    %c1_i32 = arith.constant 1 : i32
    %24 = arith.cmpi eq, %arg1, %c1_i32 : i32
    %25 = arith.extui %24 : i1 to i32
    %c0_i32_16 = arith.constant 0 : i32
    %26 = arith.cmpi ne, %25, %c0_i32_16 : i32
    scf.if %26 {
      %c0_17 = arith.constant 0 : index
      %c0_18 = arith.constant 0 : index
      %27 = vector.load %arg7[%c0_17, %c0_18] : memref<128x1xf32, #tpu.memory_space<vmem>>, vector<128x1xf32>
      %28 = vector.shape_cast %27 : vector<128x1xf32> to vector<1x128x1xf32>
      %cst_19 = arith.constant dense<0.000000e+00> : vector<1xf32>
      %29 = vector.multi_reduction <add>, %28, %cst_19 [1, 2] : vector<1x128x1xf32> to vector<1xf32>
      %30 = vector.shape_cast %29 : vector<1xf32> to vector<1x1x1xf32>
      %31 = vector.extract %30[0, 0, 0] : f32 from vector<1x1x1xf32>
      %32 = vector.broadcast %31 : f32 to vector<1x8x128xf32>
      %c0_20 = arith.constant 0 : index
      %c0_21 = arith.constant 0 : index
      %c0_22 = arith.constant 0 : index
      %33 = vector.load %arg6[%c0_20, %c0_21, %c0_22] : memref<1x8x128xf32, #tpu.memory_space<vmem>>, vector<1x8x128xf32>
      tpu.vector_store %arg6[%c0_20, %c0_21, %c0_22], %32 {strides = array<i32>} : memref<1x8x128xf32, #tpu.memory_space<vmem>>, vector<1x8x128xf32>,
    } else {
    }
    return
  }
  func.func @transform_0(%arg0: i32, %arg1: i32) -> (i32, i32) {
    %c0_i32 = arith.constant 0 : i32
    %c0_i32_0 = arith.constant 0 : i32
    return %arg0, %c0_i32 : i32, i32
  }
  func.func @transform_1(%arg0: i32, %arg1: i32) -> (i32, i32) {
    %c0_i32 = arith.constant 0 : i32
    %c0_i32_0 = arith.constant 0 : i32
    return %arg1, %c0_i32 : i32, i32
  }
  func.func @transform_2(%arg0: i32, %arg1: i32) -> (i32, i32) {
    %c0_i32 = arith.constant 0 : i32
    %c0_i32_0 = arith.constant 0 : i32
    return %arg0, %c0_i32 : i32, i32
  }
  func.func @transform_3(%arg0: i32, %arg1: i32) -> (i32, i32) {
    %c0_i32 = arith.constant 0 : i32
    %c0_i32_0 = arith.constant 0 : i32
    return %c0_i32, %arg1 : i32, i32
  }
  func.func @transform_4(%arg0: i32, %arg1: i32) -> (i32, i32, i32) {
    %c0_i32 = arith.constant 0 : i32
    %c0_i32_0 = arith.constant 0 : i32
    %c0_i32_1 = arith.constant 0 : i32
    return %arg0, %c0_i32, %c0_i32_0 : i32, i32, i32
  }
}

</mosaic_0001>

<bundles_post_ra>
// kernel: tpu_custom_call.1
= control target key start
LH: loop header
LB: loop body
LE: loop exit
PB: predicated region body
PF: predicated region fallthrough
CT: control target
= control target key end

     0   :  { %9 = vsyncpa [#allocation4], 0  ;;  %s1564_s0 = inlined_call_operand.vmem [shape: bf16[256,128], index: 0, kind: input, shape index: {}]   ;;  %s1565_s1 = inlined_call_operand.vmem [shape: bf16[256,128], index: 1, kind: input, shape index: {}]   ;;  %s1566_s2 = inlined_call_operand.vmem [shape: f32[256,1], index: 2, kind: input, shape index: {}]   ;;  %s1567_s3 = inlined_call_operand.vmem [shape: f32[1,256], index: 3, kind: input, shape index: {}]   ;;  %s1568_s4 = inlined_call_operand.hbm [shape: f32[2,8,128], index: 4, kind: output, shape index: {}]  }
   0x1   :  { %11 = vsyncpa [#allocation4 + $0x1], 0  ;;  %s1274_s15 = smov 0   ;;  %s1276_s16 = smov 0  }
   0x2   :  { %s1278_s17 = smov 0   ;;  %s1280_s18 = smov 0  }
   0x3   :  { %s1282_s19 = smov 0   ;;  %s1284_s20 = smov 0  }
   0x4   :  { %s1286_s21 = smov 0   ;;  %s1288_s22 = smov 0  }
   0x5 LB: > { %1573 = sst [smem:[#allocation6_spill]] %s1236_s20  ;;  %s958_s23 = sadd.s32 4294967295, %s1244_s22   ;;  %s1244_s22 = sphi %s1288_s22, %s17_s22   ;;  %s1240_s21 = sphi %s1286_s21, %s1583_s21   ;;  %s1236_s20 = sphi %s1284_s20, %s1582_s20   ;;  %s1232_s19 = sphi %s1282_s19, %s1581_s19   ;;  %s1228_s18 = sphi %s1280_s18, %s1580_s18   ;;  %s1224_s17 = sphi %s1278_s17, %s1586_s17   ;;  %s1220_s16 = sphi %s1276_s16, %s1585_s16   ;;  %s1216_s15 = sphi %s1274_s15, %s1584_s15  }
   0x6   : > { %1574 = sst [smem:[#allocation7_spill]] %s1240_s21  ;;  %s959_s24 = sadd.s32 4294967294, %s1244_s22  }
   0x7   : > { %s26_s25 = sadd.s32 1, %s1236_s20  ;;  %s29_s26 = sadd.s32 1, %s1240_s21 }
   0x8   : > { %p27_p0 = scmp.ge.s32.totalorder %s26_s25, 2  ;;  %p150_p1 = scmp.ne.s32.totalorder %s1224_s17, %s1220_s16 }
   0x9   : > { %p151_p2 = scmp.eq.s32.totalorder %s958_s23, 3  ;;  %p156_p4 = scmp.ne.s32.totalorder %s1220_s16, %s1216_s15 }
   0xa   : > { %s1588_s25 = smov (%p27_p0, %s26_s25), 0  ;;  %s1590_s26 = smov (!%p27_p0, %s29_s26), %s1240_s21 }
   0xb   : > { %1575 = sst [smem:[#allocation8_spill]] %s1588_s25  ;;  %p1323_p3 = por %p151_p2, %p150_p1 }
   0xc   : > { %p31_p5 = scmp.ge.s32.totalorder %s1590_s26, 2  ;;  %p157_p6 = scmp.eq.s32.totalorder %s959_s24, 3 }
   0xd   : > { %p962_p7 = scmp.ge.s32.totalorder %s1244_s22, 1  ;;  %p208_p8 = scmp.lt.s32.totalorder %s1244_s22, 5 }
   0xe   : > { %s1592_s26 = smov (%p31_p5, %s1590_s26), 0  ;;  %p1333_p9 = por %p157_p6, %p156_p4 }
   0xf   : > { %1577 = sst [smem:[#allocation9_spill]] %s1592_s26  ;;  %p209_p10 = pnand %p962_p7, %p208_p8 }
  0x10   : > { %s137_s29 = ssub.s32 %s1240_s21, %s1592_s26  ;;  %s140_s30 = sadd.s32 1, %s1224_s17 }
  0x11   : > { %p138_p11 = scmp.eq.s32.totalorder %s137_s29, 0  ;;  %212 = sbr.rel (%p209_p10) target bundleno = 749 (0x2ed), region = 36 }
  0x12   : > { %s1569_s6 = sand.u32 (!%p209_p10), 1, %s1220_s16   ;;  %s964_s7 = sshll.u32 (!%p209_p10), %s1232_s19, 4 }
  0x13   : > { %s1341_s5 = scalar_select %p138_p11, %s1224_s17, %s140_s30  }
  0x14   : > { %s1347_s8 = sshll.u32 (!%p209_p10), %s1569_s6, 3  ;;  %p248_p12 = scmp.lt.s32.totalorder (!%p209_p10), %s964_s7, 31 }
  0x15   : > { %s966_s9 = sshll.u32 (!%p209_p10), %s1228_s18, 4  ;;  %p265_p0 = scmp.lt.s32.totalorder (!%p209_p10), %s1228_s18, 1 }
  0x16   : > { %p254_p13 = scmp.lt.s32.totalorder (!%p209_p10), %s966_s9, 31  ;;  %s246_s12 = scalar_lea.vmem (!%p209_p10), [#allocation3], %s1347_s8 }
  0x17   : > { %p970_p1 = scmp.ne.s32.totalorder (!%p209_p10), %s1228_s18, 0 }
  0x18   : > { %s1594_s7 = smov (!%p248_p12, %s964_s7), 31  ;;  %s1596_s9 = smov (!%p254_p13, %s966_s9), 31 }
  0x19   : > { %s965_s10 = sshll.u32 %s1594_s7, 2  ;;  %s969_s11 = sshll.u32 %s1594_s7, 3  ;;  %vm273_vm0 = vcmask (!%p970_p1), 7168   ;;  %v1246_v0 = vmov (!%p970_p1), 0.0  }
  0x1a   : > { %s1354_s14 = scalar_lea.vmem %s1564_s0, %s965_s10  ;;  %s1359_s29 = scalar_lea.vmem %s1566_s2, %s969_s11  ;;  %274 = vst.msk [vmem:[#allocation2] sm:$0xff] (!%p970_p1), %vm273_vm0, %v1246_v0  ;;  %275 = vst.msk [vmem:[#allocation2 + $0x8] sm:$0xff] (!%p970_p1), %vm273_vm0, %v1246_v0 }
  0x1b   : > { %s1362_s30 = scalar_select %p265_p0, %s1228_s18, 1 }
  0x1c   : > { %s967_s6 = sshll.u32 %s1596_s9, 2  ;;  %272 = sbr.rel (%p970_p1) target bundleno = 35 (0x23), region = 40  ;;  %276 = vst.msk [vmem:[#allocation2 + $0x10] sm:$0xff] (!%p970_p1), %vm273_vm0, %v1246_v0  ;;  %277 = vst.msk [vmem:[#allocation2 + $0x18] sm:$0xff] (!%p970_p1), %vm273_vm0, %v1246_v0 }
  0x1d   : > { %s1367_s21 = scalar_lea.vmem %s1565_s1, %s967_s6  ;;  %s267_s10 = scalar_lea.vmem %s1567_s3, %s1362_s30  ;;  %278 = vst.msk [vmem:[#allocation2 + $0x20] sm:$0xff] (!%p970_p1), %vm273_vm0, %v1246_v0  ;;  %279 = vst.msk [vmem:[#allocation2 + $0x28] sm:$0xff] (!%p970_p1), %vm273_vm0, %v1246_v0 }
  0x1e   : > { %280 = vst.msk [vmem:[#allocation2 + $0x30] sm:$0xff] (!%p970_p1), %vm273_vm0, %v1246_v0  ;;  %281 = vst.msk [vmem:[#allocation2 + $0x38] sm:$0xff] (!%p970_p1), %vm273_vm0, %v1246_v0 }
  0x1f   : > { %282 = vst.msk [vmem:[#allocation2 + $0x40] sm:$0xff] (!%p970_p1), %vm273_vm0, %v1246_v0  ;;  %283 = vst.msk [vmem:[#allocation2 + $0x48] sm:$0xff] (!%p970_p1), %vm273_vm0, %v1246_v0 }
  0x20   : > { %284 = vst.msk [vmem:[#allocation2 + $0x50] sm:$0xff] (!%p970_p1), %vm273_vm0, %v1246_v0  ;;  %285 = vst.msk [vmem:[#allocation2 + $0x58] sm:$0xff] (!%p970_p1), %vm273_vm0, %v1246_v0 }
  0x21   : > { %286 = vst.msk [vmem:[#allocation2 + $0x60] sm:$0xff] (!%p970_p1), %vm273_vm0, %v1246_v0  ;;  %287 = vst.msk [vmem:[#allocation2 + $0x68] sm:$0xff] (!%p970_p1), %vm273_vm0, %v1246_v0 }
  0x22   : > { %288 = vst.msk [vmem:[#allocation2 + $0x70] sm:$0xff] (!%p970_p1), %vm273_vm0, %v1246_v0  ;;  %289 = vst.msk [vmem:[#allocation2 + $0x78] sm:$0xff] (!%p970_p1), %vm273_vm0, %v1246_v0 }
  0x23 PF: > { %v1134_v1 = vld [vmem:[%s1367_s21] sm:$0xff]   ;;  %v1135_v2 = vld [vmem:[%s1367_s21 + $0x8] sm:$0xff]   ;;  %v1247_v3 = vmov 0   ;;  %v1136_v4 = vld [vmem:[%s1367_s21 + $0x10] sm:$0xff]   ;;  %vm762_vm1 = vcmask 7168   ;;  %p988_p2 = scmp.ne.s32.totalorder %s1228_s18, 1 }
  0x24   : > { %1132 = vset.pattern.permute.xlu0 %v1247_v3  ;;  %1133 = vset.pattern.permute.xlu1 %v1247_v3  ;;  %v1142_v5 = vld [vmem:[%s1354_s14] sm:$0xff]   ;;  %v1137_v7 = vld [vmem:[%s1367_s21 + $0x18] sm:$0xff]   ;;  %v517_v9 = vld [vmem:[%s1359_s29 + $0x10] sm:$0xff] }
  0x25   : > { %1009 = vmatprep.subr.bf16.mxu0 %v1134_v1  ;;  %1041 = vmatprep.subr.bf16.mxu1 %v1134_v1  ;;  %v1143_v6 = vld [vmem:[%s1354_s14 + $0x20] sm:$0xff]   ;;  %v516_v10 = vld [vmem:[%s1359_s29 + $0x8] sm:$0xff]  ;;  %v518_v11 = vld [vmem:[%s1359_s29 + $0x18] sm:$0xff] }
  0x26   : > { %1010 = vmatpush3.bf16.xpose.msra.mxu0 %v1134_v1  ;;  %1049 = vmatpush3.bf16.xpose.msra.mxu1 %v1134_v1  ;;  %v515_v8 = vld [vmem:[%s1359_s29] sm:$0xff]  ;;  %v520_v13 = vld [vmem:[%s1359_s29 + $0x28] sm:$0xff]  ;;  %v521_v15 = vld [vmem:[%s1359_s29 + $0x30] sm:$0xff] }
  0x27   : > { %1011 = vmatprep.subr.bf16.mxu0 %v1135_v2  ;;  %1042 = vmatprep.subr.bf16.mxu1 %v1135_v2  ;;  %v519_v12 = vld [vmem:[%s1359_s29 + $0x20] sm:$0xff]  ;;  %v522_v16 = vld [vmem:[%s1359_s29 + $0x38] sm:$0xff]  ;;  %v524_v18 = vld [vmem:[%s1359_s29 + $0x48] sm:$0xff] }
  0x28   : > { %1025 = vmatprep.mubr.bf16.mxu0 %v1142_v5  ;;  %1033 = vmatprep.mubr.bf16.mxu1 %v1143_v6  ;;  %v1138_v14 = vld [vmem:[%s1367_s21 + $0x20] sm:$0xff]   ;;  %v1139_v19 = vld [vmem:[%s1367_s21 + $0x28] sm:$0xff]   ;;  %v525_v20 = vld [vmem:[%s1359_s29 + $0x50] sm:$0xff] }
  0x29   : > { %533 = vperm.xlu0 %1132, %v515_v8   ;;  %543 = vperm.xlu1 %1133, %v517_v9   ;;  %v523_v17 = vld [vmem:[%s1359_s29 + $0x40] sm:$0xff]  ;;  %v526_v21 = vld [vmem:[%s1359_s29 + $0x58] sm:$0xff]  ;;  %v528_v23 = vld [vmem:[%s1359_s29 + $0x68] sm:$0xff] }
  0x2a   : > { %v527_v22 = vld [vmem:[%s1359_s29 + $0x60] sm:$0xff]  ;;  %v1140_v24 = vld [vmem:[%s1367_s21 + $0x30] sm:$0xff]   ;;  %v530_v26 = vld [vmem:[%s1359_s29 + $0x78] sm:$0xff] }
  0x2b   : > { %v529_v25 = vld [vmem:[%s1359_s29 + $0x70] sm:$0xff]  ;;  %v1141_v27 = vld [vmem:[%s1367_s21 + $0x38] sm:$0xff]   ;;  %v1144_v28 = vld [vmem:[%s1354_s14 + $0x8] sm:$0xff]  }
  0x2c   : > { %v1145_v29 = vld [vmem:[%s1354_s14 + $0x28] sm:$0xff]   ;;  %v1146_v30 = vld [vmem:[%s1354_s14 + $0x10] sm:$0xff]   ;;  %v1148_v32 = vld [vmem:[%s1354_s14 + $0x18] sm:$0xff]  }
  0x2d   : > { %538 = vperm.xlu0 %1132, %v516_v10   ;;  %548 = vperm.xlu1 %1133, %v518_v11   ;;  %v1147_v31 = vld [vmem:[%s1354_s14 + $0x30] sm:$0xff]   ;;  %v1149_v33 = vld [vmem:[%s1354_s14 + $0x38] sm:$0xff]   ;;  %v1434_v42 = vld [vmem:[%s267_s10] ss:$0 sm:$0xff] }
  0x2e   : > { %1012 = vmatpush3.bf16.xpose.msra.mxu0 %v1135_v2  ;;  %1050 = vmatpush3.bf16.xpose.msra.mxu1 %v1135_v2 }
  0x2f   : > { %1013 = vmatprep.subr.bf16.mxu0 %v1136_v4  ;;  %1043 = vmatprep.subr.bf16.mxu1 %v1136_v4 }
  0x31   : > { %553 = vperm.xlu0 %1132, %v519_v12   ;;  %558 = vperm.xlu1 %1133, %v520_v13  }
  0x35   : > { %563 = vperm.xlu0 %1132, %v521_v15   ;;  %568 = vperm.xlu1 %1133, %v522_v16  }
  0x36   : > { %1014 = vmatpush3.bf16.xpose.msra.mxu0 %v1136_v4  ;;  %1051 = vmatpush3.bf16.xpose.msra.mxu1 %v1136_v4 }
  0x37   : > { %1015 = vmatprep.subr.bf16.mxu0 %v1137_v7  ;;  %1044 = vmatprep.subr.bf16.mxu1 %v1137_v7 }
  0x39   : > { %573 = vperm.xlu0 %1132, %v523_v17   ;;  %578 = vperm.xlu1 %1133, %v524_v18  }
  0x3d   : > { %583 = vperm.xlu0 %1132, %v525_v20   ;;  %588 = vperm.xlu1 %1133, %v526_v21  }
  0x3e   : > { %1016 = vmatpush3.bf16.xpose.msra.mxu0 %v1137_v7  ;;  %1052 = vmatpush3.bf16.xpose.msra.mxu1 %v1137_v7 }
  0x3f   : > { %1017 = vmatprep.subr.bf16.mxu0 %v1138_v14  ;;  %1045 = vmatprep.subr.bf16.mxu1 %v1138_v14 }
  0x41   : > { %593 = vperm.xlu0 %1132, %v527_v22   ;;  %598 = vperm.xlu1 %1133, %v528_v23  }
  0x45   : > { %603 = vperm.xlu0 %1132, %v529_v25   ;;  %608 = vperm.xlu1 %1133, %v530_v26  }
  0x46   : > { %1018 = vmatpush3.bf16.xpose.msra.mxu0 %v1138_v14  ;;  %1053 = vmatpush3.bf16.xpose.msra.mxu1 %v1138_v14 }
  0x47   : > { %1019 = vmatprep.subr.bf16.mxu0 %v1139_v19  ;;  %1046 = vmatprep.subr.bf16.mxu1 %v1139_v19 }
  0x4e   : > { %1020 = vmatpush3.bf16.xpose.msra.mxu0 %v1139_v19  ;;  %1054 = vmatpush3.bf16.xpose.msra.mxu1 %v1139_v19 }
  0x4f   : > { %1021 = vmatprep.subr.bf16.mxu0 %v1140_v24  ;;  %1047 = vmatprep.subr.bf16.mxu1 %v1140_v24 }
  0x56   : > { %1022 = vmatpush3.bf16.xpose.msra.mxu0 %v1140_v24  ;;  %1055 = vmatpush3.bf16.xpose.msra.mxu1 %v1140_v24 }
  0x57   : > { %1023 = vmatprep.subr.bf16.mxu0 %v1141_v27  ;;  %1048 = vmatprep.subr.bf16.mxu1 %v1141_v27 }
  0x5e   : > { %1024 = vmatpush3.bf16.xpose.msra.mxu0 %v1141_v27  ;;  %1056 = vmatpush3.bf16.xpose.msra.mxu1 %v1141_v27 }
  0x65   : > { %1026 = vmatmul.mubr.bf16.vlgmr.msra.gmra.mrb[0].mxu0 %v1144_v28  ;;  %1034 = vmatmul.mubr.bf16.vlgmr.msra.gmra.mrb[0].mxu1 %v1145_v29 }
  0x66   : > { %1029 = vmatprep.mubr.bf16.mxu0 %v1146_v30  ;;  %1037 = vmatprep.mubr.bf16.mxu1 %v1147_v31 }
  0x6d   : > { %1030 = vmatmul.mubr.bf16.gmra.mrb[4].mxu0 %v1148_v32  ;;  %1038 = vmatmul.mubr.bf16.gmra.mrb[4].mxu1 %v1149_v33 }
  0xa8   : > { %v534_v34 = vpop.permute.xlu0 %533  ;;  %v544_v36 = vpop.permute.xlu1 %543 }
  0xac   : > { %v539_v35 = vpop.permute.xlu0 %538  ;;  %v549_v38 = vpop.permute.xlu1 %548 }
  0xb0   : > { %v1423_v37 = vpop.permute.xlu0 %553  ;;  %v1427_v40 = vpop.permute.xlu1 %558 }
  0xb4   : > { %v1425_v39 = vpop.permute.xlu0 %563  ;;  %v1436_v43 = vpop.permute.xlu1 %568 }
  0xb8   : > { %v574_v41 = vpop.permute.xlu0 %573  ;;  %v579_v61 = vpop.permute.xlu1 %578 }
  0xbc   : > { %v584_v44 = vpop.permute.xlu0 %583  ;;  %v589_v20 = vpop.permute.xlu1 %588 }
  0xc0   : > { %v594_v33 = vpop.permute.xlu0 %593 }
 0x138   : > { %v1027_v45 = vpop.f32.mrb[0].mxu0  ;;  %v1035_v46 = vpop.f32.mrb[0].mxu1 }
 0x139   : > { %v613_v47 = vsub.f32 %v1027_v45, %v544_v36  ;;  %v652_v48 = vsub.f32 %v1027_v45, %v1434_v42  ;;  %v621_v49 = vsub.f32 %v1035_v46, %v584_v44  ;;  %v660_v50 = vsub.f32 %v1035_v46, %v1434_v42  ;;  %v452_v51 = vpop.f32.mrb[1].mxu0  ;;  %v484_v52 = vpop.f32.mrb[1].mxu1 }
 0x13a   : > { %v1028_v53 = vpop.f32.mrb[2].mxu0  ;;  %v1036_v54 = vpop.f32.mrb[2].mxu1  ;;  %v619_v62 = vsub.f32 %v484_v52, %v574_v41  ;;  %v658_v63 = vsub.f32 %v484_v52, %v1434_v42  ;;  %v611_v0 = vsub.f32 %v452_v51, %v534_v34  ;;  %v650_v1 = vsub.f32 %v452_v51, %v1434_v42 }
 0x13b   : > { %v455_v55 = vpop.f32.mrb[3].mxu0  ;;  %v1440_v56 = vpop.f32.mrb[3].mxu1  ;;  %v629_v57 = vmax.f32 %v613_v47, 0.0  ;;  %v668_v58 = vmax.f32 %v652_v48, 0.0  ;;  %v637_v59 = vmax.f32 %v621_v49, 0.0  ;;  %v676_v60 = vmax.f32 %v660_v50, 0.0 }
 0x13c   : > { %v612_v4 = vsub.f32 %v455_v55, %v539_v35  ;;  %v635_v9 = vmax.f32 %v619_v62, 0.0  ;;  %v674_v10 = vmax.f32 %v658_v63, 0.0  ;;  %v651_v11 = vsub.f32 %v455_v55, %v1434_v42  ;;  %v604_v55 = vpop.permute.xlu0 %603  ;;  %v599_v62 = vpop.permute.xlu1 %598 }
 0x13d   : > { %v708_v5 = vadd.f32 %v676_v60, %v637_v59  ;;  %v700_v6 = vadd.f32 %v668_v58, %v629_v57  ;;  %v627_v14 = vmax.f32 %v611_v0, 0.0  ;;  %v666_v15 = vmax.f32 %v650_v1, 0.0 }
 0x13e   : > { %v614_v16 = vsub.f32 %v1028_v53, %v549_v38  ;;  %v653_v17 = vsub.f32 %v1028_v53, %v1434_v42  ;;  %v622_v21 = vsub.f32 %v1036_v54, %v589_v20  ;;  %v628_v22 = vmax.f32 %v612_v4, 0.0 }
 0x13f   : > { %734 = vadd.xlane.f32.xlu1 %v708_v5  ;;  %718 = vadd.xlane.f32.xlu0 %v700_v6  ;;  %v667_v23 = vmax.f32 %v651_v11, 0.0  ;;  %v706_v26 = vadd.f32 %v674_v10, %v635_v9  ;;  %v661_v29 = vsub.f32 %v1036_v54, %v1434_v42  ;;  %v698_v30 = vadd.f32 %v666_v15, %v627_v14 }
 0x140   : > { %v1031_v2 = vpop.f32.mrb[4].mxu0  ;;  %v1444_v3 = vpop.f32.mrb[4].mxu1  ;;  %v630_v27 = vmax.f32 %v614_v16, 0.0  ;;  %v669_v28 = vmax.f32 %v653_v17, 0.0  ;;  %v620_v31 = vsub.f32 %v1440_v56, %v579_v61  ;;  %v659_v44 = vsub.f32 %v1440_v56, %v1434_v42 }
 0x141   : > { %v468_v7 = vpop.f32.mrb[5].mxu0  ;;  %v500_v8 = vpop.f32.mrb[5].mxu1  ;;  %v617_v24 = vsub.f32 %v1031_v2, %v1425_v39  ;;  %v656_v25 = vsub.f32 %v1031_v2, %v1434_v42  ;;  %v699_v38 = vadd.f32 %v667_v23, %v628_v22  ;;  %v638_v39 = vmax.f32 %v622_v21, 0.0  ;;  %v692_v21 = vld [vmem:[#allocation2 + $0x50] sm:$0xff] }
 0x142   : > { %v1032_v12 = vpop.f32.mrb[6].mxu0  ;;  %v1447_v13 = vpop.f32.mrb[6].mxu1  ;;  %v615_v32 = vsub.f32 %v468_v7, %v1423_v37  ;;  %v654_v36 = vsub.f32 %v468_v7, %v1434_v42  ;;  %v677_v41 = vmax.f32 %v661_v29, 0.0  ;;  %v701_v45 = vadd.f32 %v669_v28, %v630_v27  ;;  %v684_v22 = vld [vmem:[#allocation2 + $0x10] sm:$0xff] }
 0x143   : > { %v1450_v18 = vpop.f32.mrb[7].mxu1  ;;  %v471_v19 = vpop.f32.mrb[7].mxu0  ;;  %730 = vadd.xlane.f32.xlu1 %v706_v26  ;;  %714 = vadd.xlane.f32.xlu0 %v698_v30  ;;  %v633_v34 = vmax.f32 %v617_v24, 0.0  ;;  %v672_v35 = vmax.f32 %v656_v25, 0.0  ;;  %v623_v46 = vsub.f32 %v500_v8, %v594_v33  ;;  %v662_v47 = vsub.f32 %v500_v8, %v1434_v42 }
 0x144   : > { %v631_v48 = vmax.f32 %v615_v32, 0.0  ;;  %v670_v37 = vmax.f32 %v654_v36, 0.0  ;;  %v618_v49 = vsub.f32 %v1032_v12, %v1436_v43  ;;  %v636_v51 = vmax.f32 %v620_v31, 0.0  ;;  %v609_v10 = vpop.permute.xlu1 %608  ;;  %v683_v31 = vld [vmem:[#allocation2 + $0x8] sm:$0xff]  ;;  %v685_v32 = vld [vmem:[#allocation2 + $0x18] sm:$0xff] }
 0x145   : > { %v704_v50 = vadd.f32 %v672_v35, %v633_v34  ;;  %v675_v52 = vmax.f32 %v659_v44, 0.0  ;;  %v657_v53 = vsub.f32 %v1032_v12, %v1434_v42  ;;  %v709_v54 = vadd.f32 %v677_v41, %v638_v39  ;;  %v693_v39 = vld [vmem:[#allocation2 + $0x58] sm:$0xff] }
 0x146   : > { %v625_v56 = vsub.f32 %v1444_v3, %v604_v55  ;;  %v664_v57 = vsub.f32 %v1444_v3, %v1434_v42  ;;  %v639_v58 = vmax.f32 %v623_v46, 0.0  ;;  %v678_v59 = vmax.f32 %v662_v47, 0.0  ;;  %v686_v47 = vld [vmem:[#allocation2 + $0x20] sm:$0xff] }
 0x147   : > { %716 = vadd.xlane.f32.xlu1 %v699_v38  ;;  %720 = vadd.xlane.f32.xlu0 %v701_v45  ;;  %v634_v60 = vmax.f32 %v618_v49, 0.0  ;;  %v702_v61 = vadd.f32 %v670_v37, %v631_v48  ;;  %v673_v43 = vmax.f32 %v657_v53, 0.0  ;;  %v616_v63 = vsub.f32 %v471_v19, %v1427_v40  ;;  %v688_v38 = vld [vmem:[#allocation2 + $0x30] sm:$0xff]  ;;  %v691_v48 = vld [vmem:[#allocation2 + $0x48] sm:$0xff]  ;;  %v689_v53 = vld [vmem:[#allocation2 + $0x38] sm:$0xff] }
 0x148   : > { %v655_v0 = vsub.f32 %v471_v19, %v1434_v42  ;;  %v707_v1 = vadd.f32 %v675_v52, %v636_v51  ;;  %v641_v2 = vmax.f32 %v625_v56, 0.0  ;;  %v680_v4 = vmax.f32 %v664_v57, 0.0  ;;  %v694_v52 = vld [vmem:[#allocation2 + $0x60] sm:$0xff] }
 0x149   : > { %v624_v5 = vsub.f32 %v1450_v18, %v599_v62  ;;  %v710_v6 = vadd.f32 %v678_v59, %v639_v58  ;;  %v663_v3 = vsub.f32 %v1450_v18, %v1434_v42  ;;  %v632_v7 = vmax.f32 %v616_v63, 0.0  ;;  %v696_v58 = vld [vmem:[#allocation2 + $0x70] sm:$0xff]  ;;  %v687_v59 = vld [vmem:[#allocation2 + $0x28] sm:$0xff] }
 0x14a   : > { %v671_v8 = vmax.f32 %v655_v0, 0.0  ;;  %v705_v9 = vadd.f32 %v673_v43, %v634_v60  ;;  %v626_v40 = vsub.f32 %v1447_v13, %v609_v10  ;;  %v712_v11 = vadd.f32 %v680_v4, %v641_v2  ;;  %v695_v63 = vld [vmem:[#allocation2 + $0x68] sm:$0xff]  ;;  %v697_v2 = vld [vmem:[#allocation2 + $0x78] sm:$0xff] }
 0x14b   : > { %726 = vadd.xlane.f32.xlu1 %v704_v50  ;;  %736 = vadd.xlane.f32.xlu0 %v709_v54  ;;  %v665_v12 = vsub.f32 %v1447_v13, %v1434_v42  ;;  %v640_v14 = vmax.f32 %v624_v5, 0.0  ;;  %v679_v15 = vmax.f32 %v663_v3, 0.0  ;;  %v690_v42 = vld [vmem:[#allocation2 + $0x40] sm:$0xff] }
 0x14c   : > { %v703_v16 = vadd.f32 %v671_v8, %v632_v7  ;;  %v642_v17 = vmax.f32 %v626_v40, 0.0  ;;  %v682_v13 = vld [vmem:[#allocation2] sm:$0xff] }
 0x14d   : > { %v681_v19 = vmax.f32 %v665_v12, 0.0  ;;  %v711_v18 = vadd.f32 %v679_v15, %v640_v14 }
 0x14f   : > { %722 = vadd.xlane.f32.xlu1 %v702_v61  ;;  %732 = vadd.xlane.f32.xlu0 %v707_v1  ;;  %v713_v20 = vadd.f32 %v681_v19, %v642_v17 }
 0x153   : > { %738 = vadd.xlane.f32.xlu1 %v710_v6  ;;  %728 = vadd.xlane.f32.xlu0 %v705_v9 }
 0x157   : > { %742 = vadd.xlane.f32.xlu1 %v712_v11  ;;  %724 = vadd.xlane.f32.xlu0 %v703_v16 }
 0x15b   : > { %740 = vadd.xlane.f32.xlu0 %v711_v18 }
 0x15f   : > { %744 = vadd.xlane.f32.xlu0 %v713_v20 }
 0x1cc   : > { %v735_v23 = vpop.xlane.xlu1 %734  ;;  %v719_v24 = vpop.xlane.xlu0 %718 }
 0x1cd   : > { %v756_v25 = vadd.f32 %v735_v23, %v692_v21  ;;  %v748_v26 = vadd.f32 %v719_v24, %v684_v22 }
 0x1cf   : > { %773 = vst.msk [vmem:[#allocation2 + $0x50] sm:$0xff] %vm762_vm1, %v756_v25  ;;  %765 = vst.msk [vmem:[#allocation2 + $0x10] sm:$0xff] %vm762_vm1, %v748_v26 }
 0x1d0   : > { %v731_v27 = vpop.xlane.xlu1 %730  ;;  %v715_v29 = vpop.xlane.xlu0 %714 }
 0x1d1   : > { %v754_v28 = vadd.f32 %v731_v27, %v690_v42  ;;  %v746_v30 = vadd.f32 %v715_v29, %v682_v13 }
 0x1d3   : > { %771 = vst.msk [vmem:[#allocation2 + $0x40] sm:$0xff] %vm762_vm1, %v754_v28  ;;  %763 = vst.msk [vmem:[#allocation2] sm:$0xff] %vm762_vm1, %v746_v30 }
 0x1d4   : > { %v717_v33 = vpop.xlane.xlu1 %716  ;;  %v721_v34 = vpop.xlane.xlu0 %720 }
 0x1d5   : > { %v747_v35 = vadd.f32 %v717_v33, %v683_v31  ;;  %v749_v36 = vadd.f32 %v721_v34, %v685_v32 }
 0x1d6   : > { %v785_v7 = vld [vmem:[#allocation2 + $0x10] sm:$0xff] (!%p988_p2) }
 0x1d7   : > { %764 = vst.msk [vmem:[#allocation2 + $0x8] sm:$0xff] %vm762_vm1, %v747_v35  ;;  %766 = vst.msk [vmem:[#allocation2 + $0x18] sm:$0xff] %vm762_vm1, %v749_v36  ;;  %v802_v40 = vsel (!%p988_p2), %vm762_vm1, %v785_v7, 0.0  ;;  %v793_v28 = vld [vmem:[#allocation2 + $0x50] sm:$0xff] (!%p988_p2) }
 0x1d8   : > { %v727_v41 = vpop.xlane.xlu1 %726  ;;  %v737_v44 = vpop.xlane.xlu0 %736  ;;  %v818_v33 = vsel (!%p988_p2), %vm762_vm1, %v793_v28, 0.0 }
 0x1d9   : > { %v752_v45 = vadd.f32 %v727_v41, %v688_v38  ;;  %v757_v46 = vadd.f32 %v737_v44, %v693_v39 }
 0x1da   : > { %v783_v6 = vld [vmem:[#allocation2] sm:$0xff] (!%p988_p2) }
 0x1db   : > { %769 = vst.msk [vmem:[#allocation2 + $0x30] sm:$0xff] %vm762_vm1, %v752_v45  ;;  %774 = vst.msk [vmem:[#allocation2 + $0x58] sm:$0xff] %vm762_vm1, %v757_v46  ;;  %v799_v9 = vsel (!%p988_p2), %vm762_vm1, %v783_v6, 0.0  ;;  %v791_v24 = vld [vmem:[#allocation2 + $0x40] sm:$0xff] (!%p988_p2) }
 0x1dc   : > { %v723_v37 = vpop.xlane.xlu1 %722  ;;  %v733_v49 = vpop.xlane.xlu0 %732  ;;  %v814_v27 = vsel (!%p988_p2), %vm762_vm1, %v791_v24, 0.0 }
 0x1dd   : > { %v750_v50 = vadd.f32 %v723_v37, %v686_v47  ;;  %v755_v51 = vadd.f32 %v733_v49, %v691_v48 }
 0x1de   : > { %v784_v3 = vld [vmem:[#allocation2 + $0x8] sm:$0xff] (!%p988_p2)  ;;  %v786_v8 = vld [vmem:[#allocation2 + $0x18] sm:$0xff] (!%p988_p2) }
 0x1df   : > { %767 = vst.msk [vmem:[#allocation2 + $0x20] sm:$0xff] %vm762_vm1, %v750_v50  ;;  %772 = vst.msk [vmem:[#allocation2 + $0x48] sm:$0xff] %vm762_vm1, %v755_v51  ;;  %v800_v10 = vsel (!%p988_p2), %vm762_vm1, %v784_v3, 0.0  ;;  %v804_v14 = vsel (!%p988_p2), %vm762_vm1, %v786_v8, 0.0 }
 0x1e0   : > { %v739_v54 = vpop.xlane.xlu1 %738  ;;  %v729_v56 = vpop.xlane.xlu0 %728  ;;  %v801_v12 = vadd.f32 (!%p988_p2), %v800_v10, %v799_v9 }
 0x1e1   : > { %v758_v55 = vadd.f32 %v739_v54, %v694_v52  ;;  %v753_v57 = vadd.f32 %v729_v56, %v689_v53 }
 0x1e2   : > { %v803_v16 = vadd.f32 (!%p988_p2), %v802_v40, %v801_v12  ;;  %v789_v19 = vld [vmem:[#allocation2 + $0x30] sm:$0xff] (!%p988_p2)  ;;  %v794_v31 = vld [vmem:[#allocation2 + $0x58] sm:$0xff] (!%p988_p2) }
 0x1e3   : > { %775 = vst.msk [vmem:[#allocation2 + $0x60] sm:$0xff] %vm762_vm1, %v758_v55  ;;  %770 = vst.msk [vmem:[#allocation2 + $0x38] sm:$0xff] %vm762_vm1, %v753_v57  ;;  %v810_v23 = vsel (!%p988_p2), %vm762_vm1, %v789_v19, 0.0  ;;  %v820_v36 = vsel (!%p988_p2), %vm762_vm1, %v794_v31, 0.0 }
 0x1e4   : > { %v743_v60 = vpop.xlane.xlu1 %742  ;;  %v725_v62 = vpop.xlane.xlu0 %724  ;;  %v805_v18 = vadd.f32 (!%p988_p2), %v804_v14, %v803_v16 }
 0x1e5   : > { %v760_v61 = vadd.f32 %v743_v60, %v696_v58  ;;  %v751_v43 = vadd.f32 %v725_v62, %v687_v59 }
 0x1e6   : > { %v787_v11 = vld [vmem:[#allocation2 + $0x20] sm:$0xff] (!%p988_p2)  ;;  %v792_v42 = vld [vmem:[#allocation2 + $0x48] sm:$0xff] (!%p988_p2) }
 0x1e7   : > { %777 = vst.msk [vmem:[#allocation2 + $0x70] sm:$0xff] %vm762_vm1, %v760_v61  ;;  %768 = vst.msk [vmem:[#allocation2 + $0x28] sm:$0xff] %vm762_vm1, %v751_v43  ;;  %v806_v17 = vsel (!%p988_p2), %vm762_vm1, %v787_v11, 0.0  ;;  %v816_v30 = vsel (!%p988_p2), %vm762_vm1, %v792_v42, 0.0 }
 0x1e8   : > { %v741_v0 = vpop.xlane.xlu0 %740  ;;  %v807_v22 = vadd.f32 (!%p988_p2), %v806_v17, %v805_v18 }
 0x1e9   : > { %v759_v1 = vadd.f32 %v741_v0, %v695_v63  ;;  %782 = sbr.rel (%p988_p2) target bundleno = 724 (0x2d4), region = 44 }
 0x1ea   : > { %v790_v21 = vld [vmem:[#allocation2 + $0x38] sm:$0xff] (!%p988_p2)  ;;  %v795_v34 = vld [vmem:[#allocation2 + $0x60] sm:$0xff] (!%p988_p2) }
 0x1eb   : > { %776 = vst.msk [vmem:[#allocation2 + $0x68] sm:$0xff] %vm762_vm1, %v759_v1  ;;  %v812_v26 = vsel (!%p988_p2), %vm762_vm1, %v790_v21, 0.0  ;;  %v822_v41 = vsel (!%p988_p2), %vm762_vm1, %v795_v34, 0.0 }
 0x1ec   : > { %v745_v4 = vpop.xlane.xlu0 %744 }
 0x1ed   : > { %v761_v5 = vadd.f32 %v745_v4, %v697_v2 }
 0x1ee   : > { %v788_v15 = vld [vmem:[#allocation2 + $0x28] sm:$0xff] (!%p988_p2)  ;;  %v797_v44 = vld [vmem:[#allocation2 + $0x70] sm:$0xff] (!%p988_p2) }
 0x1ef   : > { %778 = vst.msk [vmem:[#allocation2 + $0x78] sm:$0xff] %vm762_vm1, %v761_v5  ;;  %v808_v20 = vsel (!%p988_p2), %vm762_vm1, %v788_v15, 0.0  ;;  %v826_v37 = vsel (!%p988_p2), %vm762_vm1, %v797_v44, 0.0 }
 0x1f0   : > { %v809_v25 = vadd.f32 %v808_v20, %v807_v22 }
 0x1f2   : > { %v811_v13 = vadd.f32 %v810_v23, %v809_v25  ;;  %v796_v38 = vld [vmem:[#allocation2 + $0x68] sm:$0xff] }
 0x1f3   : > { %v824_v46 = vsel %vm762_vm1, %v796_v38, 0.0 }
 0x1f4   : > { %v813_v29 = vadd.f32 %v812_v26, %v811_v13 }
 0x1f6   : > { %v815_v32 = vadd.f32 %v814_v27, %v813_v29  ;;  %v798_v47 = vld [vmem:[#allocation2 + $0x78] sm:$0xff] }
 0x1f7   : > { %v828_v50 = vsel %vm762_vm1, %v798_v47, 0.0 }
 0x1f8   : > { %v817_v35 = vadd.f32 %v816_v30, %v815_v32 }
 0x1fa   : > { %v819_v39 = vadd.f32 %v818_v33, %v817_v35 }
 0x1fc   : > { %v821_v45 = vadd.f32 %v820_v36, %v819_v39 }
 0x1fe   : > { %v823_v48 = vadd.f32 %v822_v41, %v821_v45 }
 0x200   : > { %v825_v49 = vadd.f32 %v824_v46, %v823_v48 }
 0x202   : > { %v827_v51 = vadd.f32 %v826_v37, %v825_v49 }
 0x204   : > { %v829_v52 = vadd.f32 %v828_v50, %v827_v51 }
 0x206   : > { %830 = vadd.xlane.f32.xlu0 %v829_v52 }
 0x293   : > { %v831_v53 = vpop.xlane.xlu0 %830 }
 0x294   : > { %v832_v54 = vrot.slane %v831_v53, 4 }
 0x296   : > { %v833_v55 = vadd.f32 %v832_v54, %v831_v53 }
 0x298   : > { %v834_v56 = vrot.slane %v833_v55, 2 }
 0x29a   : > { %v835_v57 = vadd.f32 %v834_v56, %v833_v55 }
 0x29c   : > { %v836_v58 = vrot.slane %v835_v57, 1 }
 0x29e   : > { %v837_v59 = vadd.f32 %v836_v58, %v835_v57 }
 0x2a0   : > { %1057 = vpush %v837_v59 }
 0x2d1   : > { %s1058_s18 = spop %1057 }
 0x2d2   : > { %v839_v60 = vstv %s1058_s18 }
 0x2d3   : > { %840 = vst [vmem:[%s246_s12] sm:$0xff] %v839_v60 }
 0x2d4 PF: > { %s990_s25 = sshll.u32 %s1232_s19, 7  ;;  %s855_s11 = sshll.u32 %s246_s12, 4  ;;  %s856_s11 = int_to_ptr.vmem [resolvable:$true] %s855_s11 }
 0x2d5   : > { %s1513_s9 = scalar_lea.hbm %s1568_s4, %s990_s25  ;;  %s1579_s13 = sand.u32 1, %s1220_s16  }
 0x2d6   : > { %s842_s14 = scalar_lea.sflag [#allocation4], %s1579_s13  ;;  %s1150_s23 = scalar_lea.vmem %s856_s11, 128 }
 0x2d7   : > { %p1151_p4 = scmp.ne.s32.totalorder %s856_s11, %s1150_s23  ;;  %s1248_s24 = smov [#allocation3]  }
 0x2d8   : > { %s1154_s29 = sshll.u32 %s1248_s24, 4  ;;  %s1155_s29 = int_to_ptr.vmem [resolvable:$false] %s1154_s29 }
 0x2d9   : > { %p1152_p5 = pnand %p1151_p4, %p1323_p3  ;;  %s1156_s30 = scalar_lea.vmem %s1155_s29, 256 }
 0x2da   : > { %p1157_p7 = scmp.lt.s32.totalorder %s856_s11, %s1155_s29  ;;  %p1158_p8 = scmp.lt.s32.totalorder %s1156_s30, %s1150_s23 }
 0x2db   : > { %p1153_p6 = pneg %p1152_p5 }
 0x2dc   : > { %p1159_p10 = por %p1158_p8, %p1157_p7 }
 0x2de   : > { %p1160_p11 = pnand %p1159_p10, %p1153_p6 }
 0x2e0   : > { %1163 = shalt.err (!%p1160_p11)
}
 0x2e1   : > { %s1164_s19 = scalar_lea.hbm %s1513_s9, 128  ;;  %s1168_s10 = scalar_lea.hbm %s1568_s4, 256 }
 0x2e2   : > { %p1165_p12 = scmp.ne.s32.totalorder %s1513_s9, %s1164_s19  ;;  %p1169_p1 = scmp.lt.u32.totalorder %s1513_s9, %s1568_s4 }
 0x2e3   : > { %p1170_p2 = scmp.lt.u32.totalorder %s1168_s10, %s1164_s19  ;;  %p1172_p5 = scmp.lt.u32.totalorder %s1164_s19, %s1513_s9 }
 0x2e4   : > { %p1166_p13 = pnand %p1165_p12, %p1323_p3 }
 0x2e5   : > { %p1171_p4 = por %p1170_p2, %p1169_p1 }
 0x2e6   : > { %p1167_p0 = pneg %p1166_p13 }
 0x2e7   : > { %p1173_p6 = por %p1172_p5, %p1171_p4 }
 0x2e9   : > { %p1174_p7 = pnand %p1173_p6, %p1167_p0 }
 0x2eb   : > { %1177 = shalt.err (!%p1174_p7)
}
 0x2ec   : > { %1059 = dma.vmem_to_hbm [thread:$0]  (%p1323_p3), %s856_s11, 128, %s1513_s9, %s842_s14  }
 0x2ed PF: > { %p1065_p8 = scmp.ge.s32.totalorder %s1244_s22, 2  ;;  %s867_s21 = sand.u32 1, %s1216_s15  }
 0x2ee   : > { %s868_s18 = scalar_lea.sflag [#allocation4], %s867_s21 }
 0x2ef   : > { %p1062_p10 = pnand %p1065_p8, %p1333_p9 }
 0x2f1   : > { %1211 = dma.done.wait (!%p1062_p10), %s868_s18, 128  }
 0x2f2   : > { %1213 = vsyncadd (!%p1062_p10), %s868_s18, 4294967168  ;;  %s17_s22 = sadd.s32 1, %s1244_s22   ;;  %s1580_s18 = sld [smem:[#allocation6_spill]] }
 0x2f3   : > { %p14_p11 = scmp.ge.s32.totalorder %s17_s22, 6   ;;  %s1581_s19 = sld [smem:[#allocation7_spill]] }
 0x2f4   : > { %s1582_s20 = sld [smem:[#allocation8_spill]]  ;;  %s1583_s21 = sld [smem:[#allocation9_spill]] }
 0x2f5   : > { %s1584_s15 = smov %s1220_s16  ;;  %s1585_s16 = smov %s1224_s17 }
 0x2f6   : > { %s1586_s17 = smov %s1341_s5  ;;  %16 = sbr.rel (!%p14_p11) target bundleno = 5 (0x5), region = 88 }
 0x2fd   :  { %873 = vsyncpa [#allocation4], 1 }
 0x2fe   :  { %875 = vsyncpa [#allocation4 + $0x1], 1 }

</bundles_post_ra>
